<compile_context>
chip_gen: v5e
topology: v5e:2x2
jax: 0.10.0
libtpu: 0.0.40
codegen_flags: <defaults>
</compile_context>

<pallas_src>
import functools

import jax
import jax.numpy as jnp
from jax.experimental import pallas as pl
from jax.experimental.pallas import tpu as pltpu


def _round_up(n, m):
    return ((n + m - 1) // m) * m


def teacher_mlp_kernel(x_ref, w1_ref, b1_ref, w2_ref, b2_ref, w3_ref, b3_ref, o_ref):
    # x tile: (TM, in_dim) f32 -> bf16 operands for the MXU; accumulate in f32.
    x = x_ref[...].astype(jnp.bfloat16)
    # fc1 + ReLU
    h1 = jnp.dot(x, w1_ref[...], preferred_element_type=jnp.float32)
    h1 = jnp.maximum(h1 + b1_ref[...], 0.0)
    # fc2 + ReLU
    h2 = jnp.dot(h1.astype(jnp.bfloat16), w2_ref[...], preferred_element_type=jnp.float32)
    h2 = jnp.maximum(h2 + b2_ref[...], 0.0)
    # fc3 -- written straight to the unpadded (TM, out_dim) output tile.
    out = jnp.dot(h2.astype(jnp.bfloat16), w3_ref[...], preferred_element_type=jnp.float32)
    o_ref[...] = (out + b3_ref[...]).astype(o_ref.dtype)


def _choose_tm(batch, tm):
    """Batch tile: multiple of 8, <= tm, and (when possible) >= 4 grid steps so
    the batch axis can shard across TensorCores (v7x) and pipeline DMAs."""
    if batch <= 8:
        return 8
    target = _round_up(max(1, -(-batch // 4)), 8)  # ~batch/4, rounded up to 8
    return max(8, min(tm, target, _round_up(batch, 8)))


def prepare_params(params):
    """One-time param prep (call outside the hot path): bf16 weights, f32 biases."""
    prepared = dict(params)
    for i in (1, 2, 3):
        prepared[f"w{i}"] = params[f"w{i}"].astype(jnp.bfloat16)
        prepared[f"b{i}"] = params[f"b{i}"].astype(jnp.float32)
    return prepared


def teacher_forward(x, params, *, tm=1024):
    """x: (B, input_dim) float32. params: dict of w1,b1,w2,b2,w3,b3 (weights (in,out)).

    Pass params through prepare_params() once; a raw-f32 param dict also works
    (the defensive astype below is elided by XLA when already bf16)."""
    B, in_dim = x.shape
    out_dim = params["w3"].shape[1]

    w1 = params["w1"].astype(jnp.bfloat16)
    w2 = params["w2"].astype(jnp.bfloat16)
    w3 = params["w3"].astype(jnp.bfloat16)
    b1 = params["b1"].astype(jnp.float32)
    b2 = params["b2"].astype(jnp.float32)
    b3 = params["b3"].astype(jnp.float32)

    TM = _choose_tm(B, tm)
    grid = (pl.cdiv(B, TM),)

    # Constant index_map -> weights/biases stay VMEM-resident across grid steps.
    resident = lambda a: pl.BlockSpec(a.shape, lambda i: (0,) * a.ndim)

    hidden1, hidden2 = w1.shape[1], w2.shape[1]
    flops = 2 * B * (in_dim * hidden1 + hidden1 * hidden2 + hidden2 * out_dim)
    bytes_accessed = (
        B * (in_dim * 4 + out_dim * 4)
        + 2 * (in_dim * hidden1 + hidden1 * hidden2 + hidden2 * out_dim)  # bf16 weights
        + 4 * (hidden1 + hidden2 + out_dim)                               # f32 biases
    )

    return pl.pallas_call(
        teacher_mlp_kernel,
        out_shape=jax.ShapeDtypeStruct((B, out_dim), jnp.float32),
        grid=grid,
        in_specs=[
            pl.BlockSpec((TM, in_dim), lambda i: (i, 0)),  # x: streamed over batch
            resident(w1), resident(b1),
            resident(w2), resident(b2),
            resident(w3), resident(b3),
        ],
        out_specs=pl.BlockSpec((TM, out_dim), lambda i: (i, 0)),
        compiler_params=pltpu.CompilerParams(
            dimension_semantics=("parallel",),  # shard batch axis across TCs (v7x)
        ),
        cost_estimate=pl.CostEstimate(
            flops=int(flops), transcendentals=0, bytes_accessed=int(bytes_accessed)
        ),
    )(x, w1, b1, w2, b2, w3, b3)


def init_params(key, input_dim, output_dim):
    """Deterministic init (PyTorch-style uniform fan-in bounds), weights as (in, out)."""
    dims = [(input_dim, 64), (64, 32), (32, output_dim)]
    params = {}
    keys = jax.random.split(key, 2 * len(dims))
    for i, (fan_in, fan_out) in enumerate(dims):
        bound = 1.0 / jnp.sqrt(jnp.float32(fan_in))
        params[f"w{i + 1}"] = jax.random.uniform(
            keys[2 * i], (fan_in, fan_out), jnp.float32, -bound, bound
        )
        params[f"b{i + 1}"] = jax.random.uniform(
            keys[2 * i + 1], (1, fan_out), jnp.float32, -bound, bound
        )
    return params


def _ref_forward(x, params, matmul_dtype):
    """Pure-JAX reference; matmul_dtype mirrors the kernel's operand dtype."""
    h = x
    for i in range(1, 4):
        w = params[f"w{i}"].astype(matmul_dtype)
        h = jnp.dot(h.astype(matmul_dtype), w, preferred_element_type=jnp.float32)
        h = h + params[f"b{i}"].astype(jnp.float32)
        if i < 3:
            h = jnp.maximum(h, 0.0)
    return h


if __name__ == "__main__":
    key = jax.random.PRNGKey(0)
    k_x, k_p = jax.random.split(key)

    batch, input_dim, output_dim = 256, 16, 10
    x = jax.random.normal(k_x, (batch, input_dim), jnp.float32)
    params = init_params(k_p, input_dim, output_dim)

    # One-time weight prep (bf16 cast) kept off the per-call path.
    prepared = prepare_params(params)

    # Default tm=1024; _choose_tm picks TM=64 -> grid=(4,) for this batch, so the
    # test still exercises a multi-step, pipelined / megacore-shardable grid.
    fwd = jax.jit(functools.partial(teacher_forward, tm=1024))
    out = jax.block_until_ready(fwd(x, prepared))

    assert out.shape == (batch, output_dim)

    # Bit-level check vs a reference using the same bf16 operand casts.
    expected_bf16 = _ref_forward(x, params, jnp.bfloat16)
    assert jnp.allclose(out, expected_bf16, atol=1e-3, rtol=1e-3)

    # Semantic sanity check vs the pure-f32 PyTorch-equivalent forward.
    expected_f32 = _ref_forward(x, params, jnp.float32)
    assert jnp.allclose(out, expected_f32, atol=5e-2, rtol=5e-2)

    print("KERNEL_OK")
</pallas_src>

<mosaic_0001>
module attributes {stable_mosaic.version = 11 : i64} {
  func.func @teacher_mlp_kernel(%arg0: i32, %arg1: memref<64x16xf32, #tpu.memory_space<vmem>>, %arg2: memref<16x64xbf16, #tpu.memory_space<vmem>>, %arg3: memref<1x64xf32, #tpu.memory_space<vmem>>, %arg4: memref<64x32xbf16, #tpu.memory_space<vmem>>, %arg5: memref<1x32xf32, #tpu.memory_space<vmem>>, %arg6: memref<32x10xbf16, #tpu.memory_space<vmem>>, %arg7: memref<1x10xf32, #tpu.memory_space<vmem>>, %arg8: memref<64x10xf32, #tpu.memory_space<vmem>>) attributes {dimension_semantics = [#tpu.dimension_semantics<parallel>], iteration_bounds = array<i64: 4>, scalar_prefetch = 0 : i64, scratch_operands = 0 : i64, tpu.core_type = #tpu.core_type<tc>, window_params = [{transform_indices = @transform_0, window_bounds = array<i64: 64, 16>}, {pipeline_mode = #tpu.pipeline_mode<synchronous>, transform_indices = @transform_1, window_bounds = array<i64: 16, 64>}, {pipeline_mode = #tpu.pipeline_mode<synchronous>, transform_indices = @transform_2, window_bounds = array<i64: 1, 64>}, {pipeline_mode = #tpu.pipeline_mode<synchronous>, transform_indices = @transform_3, window_bounds = array<i64: 64, 32>}, {pipeline_mode = #tpu.pipeline_mode<synchronous>, transform_indices = @transform_4, window_bounds = array<i64: 1, 32>}, {pipeline_mode = #tpu.pipeline_mode<synchronous>, transform_indices = @transform_5, window_bounds = array<i64: 32, 10>}, {pipeline_mode = #tpu.pipeline_mode<synchronous>, transform_indices = @transform_6, window_bounds = array<i64: 1, 10>}, {transform_indices = @transform_7, window_bounds = array<i64: 64, 10>}]} {
    %c0 = arith.constant 0 : index
    %c0_0 = arith.constant 0 : index
    %0 = vector.load %arg1[%c0, %c0_0] : memref<64x16xf32, #tpu.memory_space<vmem>>, vector<64x16xf32>
    %1 = arith.truncf %0 : vector<64x16xf32> to vector<64x16xbf16>
    %c0_1 = arith.constant 0 : index
    %c0_2 = arith.constant 0 : index
    %2 = vector.load %arg2[%c0_1, %c0_2] : memref<16x64xbf16, #tpu.memory_space<vmem>>, vector<16x64xbf16>
    %cst = arith.constant dense<0.000000e+00> : vector<64x64xf32>
    %3 = tpu.matmul %1, %2, %cst {dimension_numbers = #tpu.dot_dimension_numbers<[1], [0], [0], [1], [0, 0, 1, 1], [], []>} : vector<64x16xbf16>, vector<16x64xbf16>, vector<64x64xf32> -> vector<64x64xf32>
    %c0_3 = arith.constant 0 : index
    %c0_4 = arith.constant 0 : index
    %4 = vector.load %arg3[%c0_3, %c0_4] : memref<1x64xf32, #tpu.memory_space<vmem>>, vector<1x64xf32>
    %5 = vector.broadcast %4 : vector<1x64xf32> to vector<64x64xf32>
    %6 = arith.addf %3, %5 : vector<64x64xf32>
    %cst_5 = arith.constant 0.000000e+00 : f32
    %7 = vector.broadcast %cst_5 : f32 to vector<64x64xf32>
    %8 = arith.maximumf %6, %7 : vector<64x64xf32>
    %9 = arith.truncf %8 : vector<64x64xf32> to vector<64x64xbf16>
    %c0_6 = arith.constant 0 : index
    %c0_7 = arith.constant 0 : index
    %10 = vector.load %arg4[%c0_6, %c0_7] : memref<64x32xbf16, #tpu.memory_space<vmem>>, vector<64x32xbf16>
    %cst_8 = arith.constant dense<0.000000e+00> : vector<64x32xf32>
    %11 = tpu.matmul %9, %10, %cst_8 {dimension_numbers = #tpu.dot_dimension_numbers<[1], [0], [0], [1], [0, 0, 1, 1], [], []>} : vector<64x64xbf16>, vector<64x32xbf16>, vector<64x32xf32> -> vector<64x32xf32>
    %c0_9 = arith.constant 0 : index
    %c0_10 = arith.constant 0 : index
    %12 = vector.load %arg5[%c0_9, %c0_10] : memref<1x32xf32, #tpu.memory_space<vmem>>, vector<1x32xf32>
    %13 = vector.broadcast %12 : vector<1x32xf32> to vector<64x32xf32>
    %14 = arith.addf %11, %13 : vector<64x32xf32>
    %cst_11 = arith.constant 0.000000e+00 : f32
    %15 = vector.broadcast %cst_11 : f32 to vector<64x32xf32>
    %16 = arith.maximumf %14, %15 : vector<64x32xf32>
    %17 = arith.truncf %16 : vector<64x32xf32> to vector<64x32xbf16>
    %c0_12 = arith.constant 0 : index
    %c0_13 = arith.constant 0 : index
    %18 = vector.load %arg6[%c0_12, %c0_13] : memref<32x10xbf16, #tpu.memory_space<vmem>>, vector<32x10xbf16>
    %cst_14 = arith.constant dense<0.000000e+00> : vector<64x10xf32>
    %19 = tpu.matmul %17, %18, %cst_14 {dimension_numbers = #tpu.dot_dimension_numbers<[1], [0], [0], [1], [0, 0, 1, 1], [], []>} : vector<64x32xbf16>, vector<32x10xbf16>, vector<64x10xf32> -> vector<64x10xf32>
    %c0_15 = arith.constant 0 : index
    %c0_16 = arith.constant 0 : index
    %20 = vector.load %arg7[%c0_15, %c0_16] : memref<1x10xf32, #tpu.memory_space<vmem>>, vector<1x10xf32>
    %21 = vector.broadcast %20 : vector<1x10xf32> to vector<64x10xf32>
    %22 = arith.addf %19, %21 : vector<64x10xf32>
    %c0_17 = arith.constant 0 : index
    %c0_18 = arith.constant 0 : index
    %23 = vector.load %arg8[%c0_17, %c0_18] : memref<64x10xf32, #tpu.memory_space<vmem>>, vector<64x10xf32>
    tpu.vector_store %arg8[%c0_17, %c0_18], %22 {strides = array<i32>} : memref<64x10xf32, #tpu.memory_space<vmem>>, vector<64x10xf32>,
    return
  }
  func.func @transform_0(%arg0: i32) -> (i32, i32) {
    %c0_i32 = arith.constant 0 : i32
    %c0_i32_0 = arith.constant 0 : i32
    return %arg0, %c0_i32 : i32, i32
  }
  func.func @transform_1(%arg0: i32) -> (i32, i32) {
    %c0_i32 = arith.constant 0 : i32
    %c0_i32_0 = arith.constant 0 : i32
    %c0_i32_1 = arith.constant 0 : i32
    return %c0_i32, %c0_i32_0 : i32, i32
  }
  func.func @transform_2(%arg0: i32) -> (i32, i32) {
    %c0_i32 = arith.constant 0 : i32
    %c0_i32_0 = arith.constant 0 : i32
    %c0_i32_1 = arith.constant 0 : i32
    return %c0_i32, %c0_i32_0 : i32, i32
  }
  func.func @transform_3(%arg0: i32) -> (i32, i32) {
    %c0_i32 = arith.constant 0 : i32
    %c0_i32_0 = arith.constant 0 : i32
    %c0_i32_1 = arith.constant 0 : i32
    return %c0_i32, %c0_i32_0 : i32, i32
  }
  func.func @transform_4(%arg0: i32) -> (i32, i32) {
    %c0_i32 = arith.constant 0 : i32
    %c0_i32_0 = arith.constant 0 : i32
    %c0_i32_1 = arith.constant 0 : i32
    return %c0_i32, %c0_i32_0 : i32, i32
  }
  func.func @transform_5(%arg0: i32) -> (i32, i32) {
    %c0_i32 = arith.constant 0 : i32
    %c0_i32_0 = arith.constant 0 : i32
    %c0_i32_1 = arith.constant 0 : i32
    return %c0_i32, %c0_i32_0 : i32, i32
  }
  func.func @transform_6(%arg0: i32) -> (i32, i32) {
    %c0_i32 = arith.constant 0 : i32
    %c0_i32_0 = arith.constant 0 : i32
    %c0_i32_1 = arith.constant 0 : i32
    return %c0_i32, %c0_i32_0 : i32, i32
  }
  func.func @transform_7(%arg0: i32) -> (i32, i32) {
    %c0_i32 = arith.constant 0 : i32
    %c0_i32_0 = arith.constant 0 : i32
    return %arg0, %c0_i32 : i32, i32
  }
}

</mosaic_0001>

<bundles_post_ra>
// kernel: teacher_forward.1
= control target key start
LH: loop header
LB: loop body
LE: loop exit
PB: predicated region body
PF: predicated region fallthrough
CT: control target
= control target key end

     0   :  { %s699_s24 = smov 0   ;;  %s769_s0 = inlined_call_operand.vmem [shape: f32[256,16], index: 0, kind: input, shape index: {}]   ;;  %s770_s1 = inlined_call_operand.vmem [shape: bf16[16,64], index: 1, kind: input, shape index: {}]   ;;  %s771_s2 = inlined_call_operand.vmem [shape: f32[1,64], index: 2, kind: input, shape index: {}]   ;;  %s772_s3 = inlined_call_operand.vmem [shape: bf16[64,32], index: 3, kind: input, shape index: {}]   ;;  %s773_s4 = inlined_call_operand.vmem [shape: f32[1,32], index: 4, kind: input, shape index: {}]   ;;  %s774_s5 = inlined_call_operand.vmem [shape: bf16[32,10], index: 5, kind: input, shape index: {}]   ;;  %s775_s6 = inlined_call_operand.vmem [shape: f32[1,10], index: 6, kind: input, shape index: {}]   ;;  %s776_s7 = inlined_call_operand.vmem [shape: f32[256,10], index: 7, kind: output, shape index: {}]  }
   0x1 LB: > { %s578_s25 = sadd.s32 4294967295, %s657_s24   ;;  %p582_p0 = scmp.ge.s32.totalorder %s657_s24, 1  ;;  %s657_s24 = sphi %s699_s24, %s17_s24  }
   0x2   : > { %p238_p1 = scmp.lt.s32.totalorder %s657_s24, 5 }
   0x4   : > { %p239_p2 = pnand %p582_p0, %p238_p1 }
   0x5   : > { %s583_s28 = sshll.u32 (!%p239_p2), %s578_s25, 3 }
   0x6   : > { %242 = sbr.rel (%p239_p2) target bundleno = 494 (0x1ee), region = 48  ;;  %p271_p3 = scmp.lt.s32.totalorder (!%p239_p2), %s583_s28, 31 }
   0xb   : > { %v629_v0 = vld [vmem:[%s770_s1] sm:$0xff]  ;;  %s778_s28 = smov (!%p271_p3, %s583_s28), 31  ;;  %vm307_vm0 = vcmask 130048   ;;  %v633_v13 = vld [vmem:[%s772_s3 + $0x18] sm:$0xff]  ;;  %v632_v14 = vld [vmem:[%s772_s3 + $0x10] sm:$0xff]  ;;  %vm397_vm1 = vcmask 523264  }
   0xc   : > { %327 = vmatpush.bf16.msra.mxu0 %v629_v0  ;;  %s584_s29 = sshll.u32 %s778_s28, 3  ;;  %414 = vmatpush.bf16.msra.mxu1 %v633_v13  ;;  %v631_v15 = vld [vmem:[%s772_s3 + $0x8] sm:$0xff]  ;;  %v630_v16 = vld [vmem:[%s772_s3] sm:$0xff]  ;;  %vm471_vm2 = vcmask 261120   ;;  %vm513_vm3 = vcmask 80896  }
   0xd   : > { %s274_s9 = scalar_lea.vmem %s769_s0, %s584_s29  ;;  %636 = vmatpush.bf16.msra.mxu3 %v633_v13  ;;  %v648_v18 = vld [vmem:[%s771_s2] ss:$0 sm:$0xff]  ;;  %v635_v46 = vld [vmem:[%s774_s5 + $0x8] sm:$0xff]  ;;  %s280_s10 = scalar_lea.vmem %s776_s7, %s584_s29 }
   0xe   : > { %v283_v1 = vld [vmem:[%s274_s9] sm:$0xff]  ;;  %v284_v2 = vld [vmem:[%s274_s9 + $0x8] sm:$0xff]  ;;  %v285_v4 = vld [vmem:[%s274_s9 + $0x10] sm:$0xff]  ;;  %490 = vmatpush.bf16.msra.mxu2 %v635_v46 }
   0xf   : > { %v291_v3 = vpack.c.bf16 %v284_v2, %v283_v1  ;;  %v286_v5 = vld [vmem:[%s274_s9 + $0x18] sm:$0xff]  ;;  %v287_v7 = vld [vmem:[%s274_s9 + $0x20] sm:$0xff]  ;;  %v288_v8 = vld [vmem:[%s274_s9 + $0x28] sm:$0xff] }
  0x10   : > { %v292_v6 = vpack.c.bf16 %v286_v5, %v285_v4  ;;  %v293_v9 = vpack.c.bf16 %v288_v8, %v287_v7  ;;  %v289_v10 = vld [vmem:[%s274_s9 + $0x30] sm:$0xff]  ;;  %v290_v11 = vld [vmem:[%s274_s9 + $0x38] sm:$0xff]  ;;  %415 = vmatpush.bf16.msra.mxu1 %v632_v14  ;;  %v634_v47 = vld [vmem:[%s774_s5] sm:$0xff] }
  0x11   : > { %591 = vmatmul.msk.bf16.vlgmr.msra.gmra.mxu0 %vm307_vm0, %v291_v3  ;;  %v294_v12 = vpack.c.bf16 %v290_v11, %v289_v10  ;;  %637 = vmatpush.bf16.msra.mxu3 %v632_v14  ;;  %v649_v49 = vld [vmem:[%s773_s4] ss:$0 sm:$0xff] }
  0x12   : > { %491 = vmatpush.bf16.msra.mxu2 %v634_v47  ;;  %v650_v13 = vld [vmem:[%s775_s6] ss:$0 sm:$0xff] }
  0x14   : > { %416 = vmatpush.bf16.msra.mxu1 %v631_v15 }
  0x15   : > { %638 = vmatpush.bf16.msra.mxu3 %v631_v15 }
  0x18   : > { %417 = vmatpush.bf16.msra.mxu1 %v630_v16 }
  0x19   : > { %639 = vmatpush.bf16.msra.mxu3 %v630_v16 }
  0x21   : > { %592 = vmatmul.msk.bf16.gmra.mxu0 %vm307_vm0, %v292_v6 }
  0x31   : > { %593 = vmatmul.msk.bf16.gmra.mxu0 %vm307_vm0, %v293_v9 }
  0x41   : > { %594 = vmatmul.msk.bf16.gmra.mxu0 %vm307_vm0, %v294_v12 }
  0x8e   : > { %v329_v17 = vpop.f32.mrf.mxu0 }
  0x8f   : > { %v330_v19 = vadd.f32 %v648_v18, %v329_v17 }
  0x91   : > { %v349_v22 = vmax.f32 %v330_v19, 0.0 }
  0x96   : > { %v331_v20 = vpop.f32.mrf.mxu0 }
  0x97   : > { %v332_v21 = vadd.f32 %v648_v18, %v331_v20 }
  0x99   : > { %v350_v23 = vmax.f32 %v332_v21, 0.0 }
  0x9b   : > { %v357_v24 = vpack.c.bf16 %v350_v23, %v349_v22 }
  0x9d   : > { %611 = vmatmul.msk.bf16.vlgmr.msra.gmra.mxu1 %vm397_vm1, %v357_v24 }
  0x9e   : > { %v334_v25 = vpop.f32.mrf.mxu0 }
  0x9f   : > { %v335_v26 = vadd.f32 %v648_v18, %v334_v25 }
  0xa1   : > { %v351_v29 = vmax.f32 %v335_v26, 0.0 }
  0xa6   : > { %v336_v27 = vpop.f32.mrf.mxu0 }
  0xa7   : > { %v337_v28 = vadd.f32 %v648_v18, %v336_v27 }
  0xa9   : > { %v352_v30 = vmax.f32 %v337_v28, 0.0 }
  0xab   : > { %v358_v31 = vpack.c.bf16 %v352_v30, %v351_v29 }
  0xad   : > { %612 = vmatmul.msk.bf16.vlgmr.msra.gmra.mxu3 %vm397_vm1, %v358_v31 }
  0xae   : > { %v339_v32 = vpop.f32.mrf.mxu0 }
  0xaf   : > { %v340_v33 = vadd.f32 %v648_v18, %v339_v32 }
  0xb1   : > { %v353_v36 = vmax.f32 %v340_v33, 0.0 }
  0xb6   : > { %v341_v34 = vpop.f32.mrf.mxu0 }
  0xb7   : > { %v342_v35 = vadd.f32 %v648_v18, %v341_v34 }
  0xb9   : > { %v354_v37 = vmax.f32 %v342_v35, 0.0 }
  0xbb   : > { %v359_v38 = vpack.c.bf16 %v354_v37, %v353_v36 }
  0xbd   : > { %613 = vmatmul.msk.bf16.gmra.mxu3 %vm397_vm1, %v359_v38 }
  0xbe   : > { %v344_v39 = vpop.f32.mrf.mxu0 }
  0xbf   : > { %v345_v40 = vadd.f32 %v648_v18, %v344_v39 }
  0xc1   : > { %v355_v43 = vmax.f32 %v345_v40, 0.0 }
  0xc6   : > { %v346_v41 = vpop.f32.mrf.mxu0 }
  0xc7   : > { %v347_v42 = vadd.f32 %v648_v18, %v346_v41 }
  0xc9   : > { %v356_v44 = vmax.f32 %v347_v42, 0.0 }
  0xcb   : > { %v360_v45 = vpack.c.bf16 %v356_v44, %v355_v43 }
  0xcd   : > { %614 = vmatmul.msk.bf16.gmra.mxu3 %vm397_vm1, %v360_v45 }
 0x11a   : > { %v419_v48 = vpop.f32.mrf.mxu1 }
 0x11b   : > { %v420_v50 = vadd.f32 %v649_v49, %v419_v48 }
 0x11d   : > { %v439_v53 = vmax.f32 %v420_v50, 0.0 }
 0x122   : > { %v421_v51 = vpop.f32.mrf.mxu1 }
 0x123   : > { %v422_v52 = vadd.f32 %v649_v49, %v421_v51 }
 0x125   : > { %v440_v54 = vmax.f32 %v422_v52, 0.0 }
 0x127   : > { %v447_v55 = vpack.c.bf16 %v440_v54, %v439_v53 }
 0x129   : > { %623 = vmatmul.msk.bf16.vlgmr.msra.gmra.mxu2 %vm471_vm2, %v447_v55 }
 0x130   : > { %v424_v56 = vpop.f32.mrf.mxu3 }
 0x131   : > { %v425_v57 = vadd.f32 %v649_v49, %v424_v56 }
 0x133   : > { %v441_v60 = vmax.f32 %v425_v57, 0.0 }
 0x138   : > { %v426_v58 = vpop.f32.mrf.mxu3 }
 0x139   : > { %v427_v59 = vadd.f32 %v649_v49, %v426_v58 }
 0x13b   : > { %v442_v61 = vmax.f32 %v427_v59, 0.0 }
 0x13d   : > { %v448_v62 = vpack.c.bf16 %v442_v61, %v441_v60 }
 0x13f   : > { %624 = vmatmul.msk.bf16.gmra.mxu2 %vm471_vm2, %v448_v62 }
 0x140   : > { %v429_v63 = vpop.f32.mrf.mxu3 }
 0x141   : > { %v430_v0 = vadd.f32 %v649_v49, %v429_v63 }
 0x143   : > { %v443_v3 = vmax.f32 %v430_v0, 0.0 }
 0x148   : > { %v431_v1 = vpop.f32.mrf.mxu3 }
 0x149   : > { %v432_v2 = vadd.f32 %v649_v49, %v431_v1 }
 0x14b   : > { %v444_v4 = vmax.f32 %v432_v2, 0.0 }
 0x14d   : > { %v449_v5 = vpack.c.bf16 %v444_v4, %v443_v3 }
 0x14f   : > { %625 = vmatmul.msk.bf16.gmra.mxu2 %vm471_vm2, %v449_v5 }
 0x150   : > { %v434_v6 = vpop.f32.mrf.mxu3 }
 0x151   : > { %v435_v7 = vadd.f32 %v649_v49, %v434_v6 }
 0x153   : > { %v445_v10 = vmax.f32 %v435_v7, 0.0 }
 0x158   : > { %v436_v8 = vpop.f32.mrf.mxu3 }
 0x159   : > { %v437_v9 = vadd.f32 %v649_v49, %v436_v8 }
 0x15b   : > { %v446_v11 = vmax.f32 %v437_v9, 0.0 }
 0x15d   : > { %v450_v12 = vpack.c.bf16 %v446_v11, %v445_v10 }
 0x15f   : > { %626 = vmatmul.msk.bf16.gmra.mxu2 %vm471_vm2, %v450_v12 }
 0x1ac   : > { %v493_v14 = vpop.f32.mrf.mxu2 }
 0x1ad   : > { %v494_v15 = vadd.f32 %v650_v13, %v493_v14 }
 0x1af   : > { %514 = vst.msk [vmem:[%s280_s10] sm:$0xff] %vm513_vm3, %v494_v15 }
 0x1b4   : > { %v495_v16 = vpop.f32.mrf.mxu2 }
 0x1b5   : > { %v496_v17 = vadd.f32 %v650_v13, %v495_v16 }
 0x1b7   : > { %515 = vst.msk [vmem:[%s280_s10 + $0x8] sm:$0xff] %vm513_vm3, %v496_v17 }
 0x1c2   : > { %v498_v18 = vpop.f32.mrf.mxu2 }
 0x1c3   : > { %v499_v19 = vadd.f32 %v650_v13, %v498_v18 }
 0x1c5   : > { %516 = vst.msk [vmem:[%s280_s10 + $0x10] sm:$0xff] %vm513_vm3, %v499_v19 }
 0x1ca   : > { %v500_v20 = vpop.f32.mrf.mxu2 }
 0x1cb   : > { %v501_v21 = vadd.f32 %v650_v13, %v500_v20 }
 0x1cd   : > { %517 = vst.msk [vmem:[%s280_s10 + $0x18] sm:$0xff] %vm513_vm3, %v501_v21 }
 0x1d2   : > { %v503_v22 = vpop.f32.mrf.mxu2 }
 0x1d3   : > { %v504_v23 = vadd.f32 %v650_v13, %v503_v22 }
 0x1d5   : > { %518 = vst.msk [vmem:[%s280_s10 + $0x20] sm:$0xff] %vm513_vm3, %v504_v23 }
 0x1da   : > { %v505_v24 = vpop.f32.mrf.mxu2 }
 0x1db   : > { %v506_v25 = vadd.f32 %v650_v13, %v505_v24 }
 0x1dd   : > { %519 = vst.msk [vmem:[%s280_s10 + $0x28] sm:$0xff] %vm513_vm3, %v506_v25 }
 0x1e2   : > { %v508_v26 = vpop.f32.mrf.mxu2 }
 0x1e3   : > { %v509_v27 = vadd.f32 %v650_v13, %v508_v26 }
 0x1e5   : > { %520 = vst.msk [vmem:[%s280_s10 + $0x30] sm:$0xff] %vm513_vm3, %v509_v27 }
 0x1ea   : > { %v510_v28 = vpop.f32.mrf.mxu2 }
 0x1eb   : > { %v511_v29 = vadd.f32 %v650_v13, %v510_v28 }
 0x1ed   : > { %521 = vst.msk [vmem:[%s280_s10 + $0x38] sm:$0xff] %vm513_vm3, %v511_v29 }
 0x1ee PF: > { %s17_s24 = sadd.s32 1, %s657_s24  }
 0x1ef   : > { %p14_p4 = scmp.ge.s32.totalorder %s17_s24, 6  }
 0x1f1   :  { %16 = sbr.rel (!%p14_p4) target bundleno = 1 (0x1), region = 78 }

</bundles_post_ra>
